<compile_context>
chip_gen: v6e
topology: v6e:2x2x1
jax: 0.10.0
libtpu: 0.0.40
codegen_flags: <defaults>
</compile_context>

<pallas_src>
import math

import jax
import jax.numpy as jnp
from jax import lax
from jax.experimental import pallas as pl
from jax.experimental.pallas import tpu as pltpu


def _self_attention_kernel(xq_ref, k_ref, v_ref, wq_ref, o_ref):
    """One query-row tile of single-head self-attention.

    xq_ref : [TQ, d_in]     query-row slice of x
    k_ref  : [S,  d_out]    precomputed keys   (constant block, VMEM-resident)
    v_ref  : [S,  d_pad]    precomputed values, zero-padded to lane width
    wq_ref : [d_in, d_out]  W_query with 1/sqrt(d_out) already folded in
    o_ref  : [TQ, d_pad]    padded context output (lane-dense store)
    """
    # Q projection for this tile only (scale already folded into wq).
    q = jnp.dot(xq_ref[...], wq_ref[...],
                preferred_element_type=jnp.float32)            # [TQ, d_out] f32

    # Attention scores: contract the last dims of q and k directly (no k.T).
    scores = lax.dot_general(
        q.astype(k_ref.dtype), k_ref[...],
        dimension_numbers=(((1,), (1,)), ((), ())),
        preferred_element_type=jnp.float32,
    )                                                           # [TQ, S] f32

    # Numerically-stable softmax numerator/denominator in f32;
    # normalization is deferred until after P @ V.
    m = jnp.max(scores, axis=-1, keepdims=True)
    p = jnp.exp(scores - m)                                     # [TQ, S]
    denom = jnp.sum(p, axis=-1, keepdims=True)                  # [TQ, 1]

    # Unnormalized context, then normalize the small [TQ, d_pad] array.
    ctx = jnp.dot(p.astype(v_ref.dtype), v_ref[...],
                  preferred_element_type=jnp.float32)           # [TQ, d_pad]
    o_ref[...] = (ctx * pl.reciprocal(denom, approx=True)).astype(o_ref.dtype)


def _pick_tq(seq):
    """Query-row tile size.

    Prefer >= 2 grid steps (so ('parallel',) shards across v7x's two
    TensorCores) while keeping tiles large multiples of 128 (v5e/v6e MXU).
    """
    cap = min(512, max(seq // 2, 8))
    for t in (512, 256, 128, 64, 32, 16, 8):
        if t <= cap and seq % t == 0:
            return t
    return seq  # full-extent block fallback (always divides seq)


def self_attention_v1(x, w_query, w_key, w_value, mxu_dtype=None):
    """Pallas implementation of SelfAttention_v1.forward.

    x:        [seq, d_in]
    w_query:  [d_in, d_out]
    w_key:    [d_in, d_out]
    w_value:  [d_in, d_out]
    mxu_dtype: dtype for MXU operands (e.g. jnp.bfloat16 on v6e/v7x);
               softmax math and accumulation stay f32. Default: x.dtype.
    returns:  [seq, d_out]
    """
    seq, d_in = x.shape
    d_out = w_query.shape[1]
    d_pad = ((d_out + 127) // 128) * 128        # lane-dense output width
    if mxu_dtype is None:
        mxu_dtype = x.dtype

    scale = 1.0 / math.sqrt(float(d_out))       # true d_out (module semantics)

    # Fold the softmax scale into W_query -> zero scaling work in the kernel.
    wq = (w_query * scale).astype(mxu_dtype)    # [d_in, d_out]

    # Precompute K / V once with plain XLA matmuls (hoisted out of the grid).
    xm = x.astype(mxu_dtype)
    k = jnp.dot(xm, w_key.astype(mxu_dtype),
                preferred_element_type=jnp.float32).astype(mxu_dtype)
    v = jnp.dot(xm, w_value.astype(mxu_dtype),
                preferred_element_type=jnp.float32)
    v = jnp.pad(v, ((0, 0), (0, d_pad - d_out))).astype(mxu_dtype)  # [S, d_pad]

    tq = _pick_tq(seq)
    grid = (seq // tq,)

    itemsize = jnp.dtype(mxu_dtype).itemsize
    flops = int(2 * seq * d_in * d_out          # Q projection
                + 2 * seq * seq * d_out         # Q @ K^T
                + 2 * seq * seq * d_pad)        # P @ V
    bytes_accessed = int(
        (seq * d_in + seq * d_out + seq * d_pad + d_in * d_out) * itemsize
        + seq * d_pad * jnp.dtype(x.dtype).itemsize)

    out_padded = pl.pallas_call(
        _self_attention_kernel,
        out_shape=jax.ShapeDtypeStruct((seq, d_pad), x.dtype),
        grid_spec=pltpu.PrefetchScalarGridSpec(
            num_scalar_prefetch=0,
            grid=grid,
            in_specs=[
                # query-row tile of x (varies with grid step)
                pl.BlockSpec((tq, d_in), lambda i: (i, 0)),
                # precomputed K / V / Wq: constant blocks -> stay VMEM-resident
                pl.BlockSpec((seq, d_out), lambda i: (0, 0)),
                pl.BlockSpec((seq, d_pad), lambda i: (0, 0)),
                pl.BlockSpec((d_in, d_out), lambda i: (0, 0)),
            ],
            out_specs=pl.BlockSpec((tq, d_pad), lambda i: (i, 0)),
        ),
        compiler_params=pltpu.CompilerParams(
            dimension_semantics=("parallel",),
            vmem_limit_bytes=48 * 1024 * 1024,
        ),
        cost_estimate=pl.CostEstimate(
            flops=flops,
            transcendentals=int(seq * seq),
            bytes_accessed=bytes_accessed,
        ),
    )(xm, k, v, wq)

    # Callers that can consume the padded layout should take out_padded
    # directly; the slice below is an extra full-array copy kept only to match
    # the module's [seq, d_out] contract.
    return out_padded[:, :d_out]


def _reference(x, w_query, w_key, w_value):
    keys = x @ w_key
    query = x @ w_query
    value = x @ w_value
    scores = query @ keys.T
    weights = jax.nn.softmax(
        scores / jnp.sqrt(jnp.float32(keys.shape[-1])), axis=-1)
    return weights @ value


if __name__ == "__main__":
    key = jax.random.PRNGKey(0)

    # --- small case matching the module's demo shapes: seq=8, d_in=d_out=32 ---
    seq, d_in, d_out = 8, 32, 32
    kx, kq, kk, kv = jax.random.split(key, 4)
    x = jax.random.normal(kx, (seq, d_in), dtype=jnp.float32)
    # torch.rand -> uniform [0, 1)
    w_query = jax.random.uniform(kq, (d_in, d_out), dtype=jnp.float32)
    w_key = jax.random.uniform(kk, (d_in, d_out), dtype=jnp.float32)
    w_value = jax.random.uniform(kv, (d_in, d_out), dtype=jnp.float32)

    out = jax.block_until_ready(self_attention_v1(x, w_query, w_key, w_value))
    ref = _reference(x, w_query, w_key, w_value)
    assert out.shape == (seq, d_out)
    assert jnp.allclose(out, ref, atol=1e-2, rtol=1e-2), "mismatch (small)"

    # --- larger case exercising the multi-step 'parallel' query grid ---
    seq2 = 512
    kx2 = jax.random.split(key, 5)[4]
    x2 = jax.random.normal(kx2, (seq2, d_in), dtype=jnp.float32)
    out2 = jax.block_until_ready(self_attention_v1(x2, w_query, w_key, w_value))
    ref2 = _reference(x2, w_query, w_key, w_value)
    assert out2.shape == (seq2, d_out)
    assert jnp.allclose(out2, ref2, atol=1e-2, rtol=1e-2), "mismatch (tiled)"

    print("KERNEL_OK")
</pallas_src>

<mosaic_0001>
module attributes {stable_mosaic.version = 11 : i64} {
  func.func @_self_attention_kernel(%arg0: i32, %arg1: memref<8x32xf32, #tpu.memory_space<vmem>>, %arg2: memref<8x32xf32, #tpu.memory_space<vmem>>, %arg3: memref<8x128xf32, #tpu.memory_space<vmem>>, %arg4: memref<32x32xf32, #tpu.memory_space<vmem>>, %arg5: memref<8x128xf32, #tpu.memory_space<vmem>>) attributes {dimension_semantics = [#tpu.dimension_semantics<parallel>], iteration_bounds = array<i64: 1>, scalar_prefetch = 0 : i64, scratch_operands = 0 : i64, tpu.core_type = #tpu.core_type<tc>, window_params = [{transform_indices = @transform_0, window_bounds = array<i64: 8, 32>}, {pipeline_mode = #tpu.pipeline_mode<synchronous>, transform_indices = @transform_1, window_bounds = array<i64: 8, 32>}, {pipeline_mode = #tpu.pipeline_mode<synchronous>, transform_indices = @transform_2, window_bounds = array<i64: 8, 128>}, {pipeline_mode = #tpu.pipeline_mode<synchronous>, transform_indices = @transform_3, window_bounds = array<i64: 32, 32>}, {transform_indices = @transform_4, window_bounds = array<i64: 8, 128>}]} {
    %c0 = arith.constant 0 : index
    %c0_0 = arith.constant 0 : index
    %0 = vector.load %arg1[%c0, %c0_0] : memref<8x32xf32, #tpu.memory_space<vmem>>, vector<8x32xf32>
    %c0_1 = arith.constant 0 : index
    %c0_2 = arith.constant 0 : index
    %1 = vector.load %arg4[%c0_1, %c0_2] : memref<32x32xf32, #tpu.memory_space<vmem>>, vector<32x32xf32>
    %cst = arith.constant dense<0.000000e+00> : vector<8x32xf32>
    %2 = tpu.matmul %0, %1, %cst {dimension_numbers = #tpu.dot_dimension_numbers<[1], [0], [0], [1], [0, 0, 1, 1], [], []>} : vector<8x32xf32>, vector<32x32xf32>, vector<8x32xf32> -> vector<8x32xf32>
    %c0_3 = arith.constant 0 : index
    %c0_4 = arith.constant 0 : index
    %3 = vector.load %arg2[%c0_3, %c0_4] : memref<8x32xf32, #tpu.memory_space<vmem>>, vector<8x32xf32>
    %cst_5 = arith.constant dense<0.000000e+00> : vector<8x8xf32>
    %4 = tpu.matmul %2, %3, %cst_5 {dimension_numbers = #tpu.dot_dimension_numbers<[1], [1], [0], [0], [0, 0, 1, 0], [], []>} : vector<8x32xf32>, vector<8x32xf32>, vector<8x8xf32> -> vector<8x8xf32>
    %cst_6 = arith.constant dense<0xFF800000> : vector<8xf32>
    %5 = vector.multi_reduction <maximumf>, %4, %cst_6 [1] : vector<8x8xf32> to vector<8xf32>
    %6 = vector.shape_cast %5 : vector<8xf32> to vector<8x1xf32>
    %7 = vector.broadcast %6 : vector<8x1xf32> to vector<8x8xf32>
    %8 = arith.subf %4, %7 : vector<8x8xf32>
    %9 = math.exp %8 : vector<8x8xf32>
    %cst_7 = arith.constant dense<0.000000e+00> : vector<8xf32>
    %10 = vector.multi_reduction <add>, %9, %cst_7 [1] : vector<8x8xf32> to vector<8xf32>
    %11 = vector.shape_cast %10 : vector<8xf32> to vector<8x1xf32>
    %c0_8 = arith.constant 0 : index
    %c0_9 = arith.constant 0 : index
    %12 = vector.load %arg3[%c0_8, %c0_9] : memref<8x128xf32, #tpu.memory_space<vmem>>, vector<8x128xf32>
    %cst_10 = arith.constant dense<0.000000e+00> : vector<8x128xf32>
    %13 = tpu.matmul %9, %12, %cst_10 {dimension_numbers = #tpu.dot_dimension_numbers<[1], [0], [0], [1], [0, 0, 1, 1], [], []>} : vector<8x8xf32>, vector<8x128xf32>, vector<8x128xf32> -> vector<8x128xf32>
    %14 = tpu.reciprocal %11 {approx = true} : vector<8x1xf32> -> vector<8x1xf32>
    %15 = vector.broadcast %14 : vector<8x1xf32> to vector<8x128xf32>
    %16 = arith.mulf %13, %15 : vector<8x128xf32>
    %c0_11 = arith.constant 0 : index
    %c0_12 = arith.constant 0 : index
    %17 = vector.load %arg5[%c0_11, %c0_12] : memref<8x128xf32, #tpu.memory_space<vmem>>, vector<8x128xf32>
    tpu.vector_store %arg5[%c0_11, %c0_12], %16 {strides = array<i32>} : memref<8x128xf32, #tpu.memory_space<vmem>>, vector<8x128xf32>,
    return
  }
  func.func @transform_0(%arg0: i32) -> (i32, i32) {
    %c0_i32 = arith.constant 0 : i32
    %c0_i32_0 = arith.constant 0 : i32
    return %arg0, %c0_i32 : i32, i32
  }
  func.func @transform_1(%arg0: i32) -> (i32, i32) {
    %c0_i32 = arith.constant 0 : i32
    %c0_i32_0 = arith.constant 0 : i32
    %c0_i32_1 = arith.constant 0 : i32
    return %c0_i32, %c0_i32_0 : i32, i32
  }
  func.func @transform_2(%arg0: i32) -> (i32, i32) {
    %c0_i32 = arith.constant 0 : i32
    %c0_i32_0 = arith.constant 0 : i32
    %c0_i32_1 = arith.constant 0 : i32
    return %c0_i32, %c0_i32_0 : i32, i32
  }
  func.func @transform_3(%arg0: i32) -> (i32, i32) {
    %c0_i32 = arith.constant 0 : i32
    %c0_i32_0 = arith.constant 0 : i32
    %c0_i32_1 = arith.constant 0 : i32
    return %c0_i32, %c0_i32_0 : i32, i32
  }
  func.func @transform_4(%arg0: i32) -> (i32, i32) {
    %c0_i32 = arith.constant 0 : i32
    %c0_i32_0 = arith.constant 0 : i32
    return %arg0, %c0_i32 : i32, i32
  }
}

</mosaic_0001>

<bundles_post_ra>
// kernel: tpu_custom_call.1
= control target key start
LH: loop header
LB: loop body
LE: loop exit
PB: predicated region body
PF: predicated region fallthrough
CT: control target
= control target key end

     0   :  { %9 = vsyncpa [#allocation3], 0  ;;  %s534_s0 = inlined_call_operand.hbm [shape: f32[8,32], index: 0, kind: input, shape index: {}]   ;;  %s535_s1 = inlined_call_operand.hbm [shape: f32[8,32], index: 1, kind: input, shape index: {}]   ;;  %s536_s2 = inlined_call_operand.hbm [shape: f32[8,128], index: 2, kind: input, shape index: {}]   ;;  %s537_s3 = inlined_call_operand.hbm [shape: f32[32,32], index: 3, kind: input, shape index: {}]   ;;  %s538_s4 = inlined_call_operand.hbm [shape: f32[8,128], index: 4, kind: output, shape index: {}]  }
   0x1   :  { %10 = vsyncpa [#allocation6], 0 }
   0x2   :  { %11 = vsyncpa [#allocation9], 0 }
   0x3   :  { %12 = vsyncpa [#allocation4], 0  ;;  %s482_s15 = smov [#allocation5]   ;;  %s483_s17 = smov [#allocation2]  }
   0x4   :  { %s29_s16 = sshll.u32 %s482_s15, 4  ;;  %s19_s18 = sshll.u32 %s483_s17, 4  ;;  %s30_s16 = int_to_ptr.vmem [resolvable:$true] %s29_s16  ;;  %s20_s18 = int_to_ptr.vmem [resolvable:$true] %s19_s18 }
   0x5   :  { %s382_s19 = scalar_lea.vmem %s30_s16, 128  ;;  %p387_p1 = scmp.lt.s32.totalorder %s30_s16, %s30_s16 }
   0x6   :  { %p383_p0 = scmp.ne.s32.totalorder %s30_s16, %s382_s19  ;;  %p388_p2 = scmp.lt.s32.totalorder %s382_s19, %s382_s19 }
   0x8   :  { %p389_p3 = por %p388_p2, %p387_p1 }
   0xa   :  { %p390_p4 = pnand %p389_p3, %p383_p0 }
   0xc   :  { %393 = shalt.err (!%p390_p4)
}
   0xd   :  { %32 = dma.hbm_to_vmem [thread:$0]  %s535_s1, 128, %s30_s16, [#allocation6]  }
   0xe   :  { %s402_s22 = scalar_lea.vmem %s20_s18, 128  ;;  %p407_p6 = scmp.lt.s32.totalorder %s20_s18, %s20_s18 }
   0xf   :  { %p403_p5 = scmp.ne.s32.totalorder %s20_s18, %s402_s22  ;;  %p408_p7 = scmp.lt.s32.totalorder %s402_s22, %s402_s22 }
  0x11   :  { %p409_p8 = por %p408_p7, %p407_p6 }
  0x13   :  { %p410_p9 = pnand %p409_p8, %p403_p5 }
  0x15   :  { %413 = shalt.err (!%p410_p9)
}
  0x16   :  { %22 = dma.hbm_to_vmem [thread:$0]  %s534_s0, 128, %s20_s18, [#allocation3]  }
  0x17   :  { %s484_s25 = smov [#allocation7]   ;;  %s485_s27 = smov [#allocation8]  }
  0x18   :  { %s39_s26 = sshll.u32 %s484_s25, 4  ;;  %s48_s28 = sshll.u32 %s485_s27, 4  ;;  %s40_s26 = int_to_ptr.vmem [resolvable:$true] %s39_s26  ;;  %s49_s28 = int_to_ptr.vmem [resolvable:$true] %s48_s28 }
  0x19   :  { %s422_s29 = scalar_lea.vmem %s40_s26, 128  ;;  %p427_p11 = scmp.lt.s32.totalorder %s40_s26, %s40_s26 }
  0x1a   :  { %p423_p10 = scmp.ne.s32.totalorder %s40_s26, %s422_s29  ;;  %p428_p12 = scmp.lt.s32.totalorder %s422_s29, %s422_s29 }
  0x1c   :  { %p429_p13 = por %p428_p12, %p427_p11 }
  0x1e   :  { %p430_p0 = pnand %p429_p13, %p423_p10 }
  0x20   :  { %433 = shalt.err (!%p430_p0)
}
  0x21   :  { %42 = dma.hbm_to_vmem [thread:$0]  %s536_s2, 128, %s40_s26, [#allocation6]  }
  0x22   :  { %s442_s5 = scalar_lea.vmem %s49_s28, 512  ;;  %p447_p2 = scmp.lt.s32.totalorder %s49_s28, %s49_s28 }
  0x23   :  { %p443_p1 = scmp.ne.s32.totalorder %s49_s28, %s442_s5  ;;  %p448_p3 = scmp.lt.s32.totalorder %s442_s5, %s442_s5 }
  0x25   :  { %p449_p4 = por %p448_p3, %p447_p2 }
  0x27   :  { %p450_p5 = pnand %p449_p4, %p443_p1 }
  0x29   :  { %453 = shalt.err (!%p450_p5)
}
  0x2a   :  { %s486_s0 = smov 128   ;;  %s487_s6 = smov 8  }
  0x2b   :  { %54 = dma.hbm_to_vmem [thread:$0]  %s537_s3, 512, %s49_s28, [#allocation9], %s486_s0, %s486_s0, %s487_s6  }
  0x2c   :  { %474 = dma.done.wait [#allocation3], 128  }
  0x2d   :  { %475 = vsyncadd [#allocation3], 4294967168 }
  0x2e   :  { %476 = dma.done.wait [#allocation6], 256  }
  0x2f   :  { %477 = vsyncadd [#allocation6], 4294967040 }
  0x30   :  { %478 = dma.done.wait [#allocation9], 512  }
  0x31   :  { %479 = vsyncadd [#allocation9], 4294966784  ;;  %v488_v0 = vmov 0.0   ;;  %vm489_vm0 = vmmov 0   ;;  %v71_v1 = vld [vmem:[#allocation8 + $0x18] sm:$0xff]  ;;  %v70_v2 = vld [vmem:[#allocation8 + $0x10] sm:$0xff] }
  0x32   :  { %340 = vmatprep.subr.mxu0 %v488_v0  ;;  %348 = vmatprep.mubr.msk.f32.mxu0 %vm489_vm0, %v488_v0  ;;  %vm72_vm1 = vcmask 261120   ;;  %v146_v3 = vld [vmem:[#allocation5] sm:$0xff]  ;;  %v69_v4 = vld [vmem:[#allocation8 + $0x8] sm:$0xff]  ;;  %v68_v5 = vld [vmem:[#allocation8] sm:$0xff]  ;;  %vm223_vm2 = vcmask 64512   ;;  %s490_s2 = smov [#allocation10]  }
  0x33   :  { %351 = vmatprep.subr.mxu1 %v488_v0  ;;  %353 = vmatprep.mubr.msk.f32.mxu1 %vm489_vm0, %v488_v0  ;;  %v67_v6 = vld [vmem:[#allocation2] sm:$0xff]  ;;  %v233_v12 = vld [vmem:[#allocation7] sm:$0xff]  ;;  %s316_s3 = sshll.u32 %s490_s2, 4  ;;  %s317_s3 = int_to_ptr.vmem [resolvable:$true] %s316_s3 }
  0x34   :  { %341 = vmatpush3.msra.mxu0 %v71_v1  ;;  %352 = vmatpush3.xpose.msk.msra.mxu1 %vm72_vm1, %v146_v3  ;;  %s454_s9 = scalar_lea.vmem %s317_s3, 128  ;;  %p459_p7 = scmp.lt.s32.totalorder %s317_s3, %s317_s3 }
  0x35   :  { %342 = vmatprep.subr.mxu0 %v488_v0  ;;  %356 = vmatprep.subr.mxu1 %v488_v0  ;;  %p455_p6 = scmp.ne.s32.totalorder %s317_s3, %s454_s9  ;;  %p460_p8 = scmp.lt.s32.totalorder %s454_s9, %s454_s9 }
  0x36   :  { %343 = vmatpush3.msra.mxu0 %v70_v2 }
  0x37   :  { %344 = vmatprep.subr.mxu0 %v488_v0  ;;  %p461_p9 = por %p460_p8, %p459_p7 }
  0x38   :  { %345 = vmatpush3.msra.mxu0 %v69_v4 }
  0x39   :  { %346 = vmatprep.subr.mxu0 %v488_v0  ;;  %p462_p10 = pnand %p461_p9, %p455_p6 }
  0x3a   :  { %347 = vmatpush3.msra.mxu0 %v68_v5 }
  0x3b   :  { %349 = vmatmul.mubr.msk.f32.vlgmr.msra.gmra.mxu0 %vm72_vm1, %v67_v6 }
  0xfb   :  { %v142_v7 = vpop.f32.mrf.mxu0 }
  0xfc   :  { %354 = vmatmul.mubr.msk.f32.vlgmr.msra.gmra.mxu1 %vm72_vm1, %v142_v7 }
  0xfd   :  { %v350_v8 = vpop.f32.mrf.mxu0  ;;  %358 = vmatprep.mubr.msk.f32.mxu1 %vm489_vm0, %v488_v0  ;;  %357 = vmatpush3.msra.mxu1 %v233_v12 }
 0x1bc   :  { %v219_v9 = vpop.f32.mrf.mxu1 }
 0x1bd   :  { %v224_v10 = vsel %vm223_vm2, %v219_v9, -inf }
 0x1be   :  { %225 = vmax.xlane.f32.xlu0 %v224_v10  ;;  %v355_v11 = vpop.f32.mrf.mxu1 }
 0x247   :  { %v226_v13 = vpop.xlane.xlu0 %225 }
 0x248   :  { %v227_v14 = vsub.f32 %v219_v9, %v226_v13 }
 0x24a   :  { %v228_v15 = vmul.f32 1.442695, %v227_v14 }
 0x24c   :  { %370 = vpow2.f32 %v228_v15 }
 0x259   :  { %v371_v16 = vpop.eup %370 }
 0x25a   :  { %359 = vmatmul.mubr.msk.f32.vlgmr.msra.gmra.mxu1 %vm223_vm2, %v371_v16  ;;  %v230_v17 = vsel %vm223_vm2, %v371_v16, 0.0 }
 0x25b   :  { %231 = vadd.xlane.f32.xlu0 %v230_v17 }
 0x2e4   :  { %v232_v18 = vpop.xlane.xlu0 %231 }
 0x2e5   :  { %372 = vrcp.f32 %v232_v18 }
 0x2f2   :  { %v373_v19 = vpop.eup %372 }
 0x31a   :  { %v303_v20 = vpop.f32.mrf.mxu1 }
 0x31b   :  { %v308_v21 = vmul.f32 %v373_v19, %v303_v20 }
 0x31c   :  { %v360_v22 = vpop.f32.mrf.mxu1 }
 0x31d   :  { %309 = vst [vmem:[#allocation10] sm:$0xff] %v308_v21 }
 0x31e   :  { %465 = shalt.err (!%p462_p10)
}
 0x31f   :  { %319 = dma.vmem_to_hbm [thread:$0]  %s317_s3, 128, %s538_s4, [#allocation4]  }
 0x320   :  { %480 = dma.done.wait [#allocation4], 128  }
 0x321   :  { %481 = vsyncadd [#allocation4], 4294967168 }
 0x322   :  { %323 = vsyncpa [#allocation3], 1 }
 0x323   :  { %324 = vsyncpa [#allocation6], 1 }
 0x324   :  { %325 = vsyncpa [#allocation9], 1 }
 0x325   :  { %326 = vsyncpa [#allocation4], 1 }

</bundles_post_ra>
